<compile_context>
chip_gen: v6e
topology: v6e:2x2x1
jax: 0.10.0
libtpu: 0.0.40
codegen_flags: <defaults>
</compile_context>

<pallas_src>
from typing import NamedTuple, Optional

import jax
import jax.numpy as jnp
from jax.experimental import pallas as pl
from jax.experimental.pallas import tpu as pltpu

_MIB = 1024 * 1024


# --------------------------------------------------------------------------- kernel
def _linear_kernel(x_ref, w_ref, b_ref, o_ref):
    # x_ref: (tb, K) row tile; w_ref: (K, N) resident weight; b_ref: (1, N) f32 bias.
    acc = jnp.dot(x_ref[...], w_ref[...], preferred_element_type=jnp.float32)
    o_ref[...] = (acc + b_ref[...]).astype(o_ref.dtype)


# ---------------------------------------------------------------- hardware awareness
def _tpu_device_kind() -> str:
    try:
        return jax.devices()[0].device_kind.lower()
    except Exception:
        return ""


def _vmem_capacity_bytes(kind: str) -> int:
    try:
        return int(pltpu.get_tpu_info().vmem_capacity_bytes)
    except Exception:
        return 64 * _MIB if "v7" in kind else 128 * _MIB


def _round_down(x: int, m: int) -> int:
    return (x // m) * m


def _pick_row_tile(M, K, N, in_isz, out_isz, resident_bytes, vmem_budget,
                   *, max_rows=None, ensure_multi_step=False, row_align=8):
    """Largest row tile that fits the VMEM budget (double-buffered x + out tiles)."""
    per_row = 2 * (K * in_isz + N * out_isz)              # 2 pipeline buffers each
    avail = max(vmem_budget - resident_bytes, per_row * 64)
    tb = max(avail // per_row, 8)
    tb = min(tb, 2048)                                     # diminishing returns past this
    if max_rows is not None:
        tb = min(tb, max(int(max_rows), 1))
    if ensure_multi_step and M >= 2 * row_align:           # v7x: keep both TCs busy
        half = _round_down(pl.cdiv(M, 2), row_align)
        if half >= row_align:
            tb = min(tb, half)
    if tb >= M:
        return M
    tb = max(_round_down(tb, row_align), min(row_align, M))
    return min(tb, M)


# --------------------------------------------------------------- tiled linear wrapper
def _tiled_linear(x2d, w2d, b2d, *, out_dtype, useful_flops, max_rows=None):
    """out[m, n] = sum_k x2d[m, k] * w2d[k, n] + b2d[0, n], tiled over rows of x2d."""
    M, K = x2d.shape
    K2, N = w2d.shape
    assert K == K2 and b2d.shape == (1, N)

    kind = _tpu_device_kind()
    vmem_cap = _vmem_capacity_bytes(kind)
    vmem_budget = min(max(vmem_cap // 2 - 4 * _MIB, 16 * _MIB), 56 * _MIB)
    vmem_limit = min(vmem_budget + 8 * _MIB, vmem_cap - 8 * _MIB)

    in_isz = jnp.dtype(x2d.dtype).itemsize
    w_isz = jnp.dtype(w2d.dtype).itemsize
    out_isz = jnp.dtype(out_dtype).itemsize
    resident_bytes = K * N * w_isz + N * 4                 # single-buffered weight + f32 bias

    row_align = 16 if in_isz < 4 else 8                    # bf16 sublane packing
    tb = _pick_row_tile(M, K, N, in_isz, out_isz, resident_bytes, vmem_budget,
                        max_rows=max_rows,
                        ensure_multi_step=("v7" in kind),
                        row_align=row_align)
    grid = (pl.cdiv(M, tb),)                               # ragged last block handled by Pallas

    cost = pl.CostEstimate(                                # useful flops, weight read once
        flops=int(useful_flops),
        transcendentals=0,
        bytes_accessed=int(M * K * in_isz + K * N * w_isz + N * 4 + M * N * out_isz),
    )

    def build(resident_single_buffer: bool):
        if resident_single_buffer:
            w_spec = pl.BlockSpec((K, N), lambda i: (0, 0), pipeline_mode=pl.Buffered(1))
            b_spec = pl.BlockSpec((1, N), lambda i: (0, 0), pipeline_mode=pl.Buffered(1))
        else:
            w_spec = pl.BlockSpec((K, N), lambda i: (0, 0))
            b_spec = pl.BlockSpec((1, N), lambda i: (0, 0))
        return pl.pallas_call(
            _linear_kernel,
            out_shape=jax.ShapeDtypeStruct((M, N), out_dtype),
            grid_spec=pl.GridSpec(
                grid=grid,
                in_specs=[
                    pl.BlockSpec((tb, K), lambda i: (i, 0)),   # streamed row tiles of x
                    w_spec,                                    # resident weight
                    b_spec,                                    # resident bias
                ],
                out_specs=pl.BlockSpec((tb, N), lambda i: (i, 0)),
            ),
            compiler_params=pltpu.CompilerParams(
                dimension_semantics=("parallel",),             # v7x: shard rows over 2 TCs
                vmem_limit_bytes=int(vmem_limit),
            ),
            cost_estimate=cost,
        )

    try:
        return build(True)(x2d, w2d, b2d)
    except Exception:
        # Fall back to default double-buffering if Buffered(1) is rejected by this jax.
        return build(False)(x2d, w2d, b2d)


# ----------------------------------------------------------------- parameter prep
class SeqRecParams(NamedTuple):
    mode: str            # "block_diag" or "flat"
    w: jax.Array         # (K, Npad) kernel weight (transposed / expanded, compute dtype)
    b: jax.Array         # (1, Npad) float32 bias
    n_valid: int         # valid output columns (= S*W for block_diag, W for flat)
    num_segments: int
    hidden_dim: int
    window_length: int


def _block_diag_byte_cap(kind: str, compute_itemsize: int) -> int:
    if "v7" in kind:
        return 12 * _MIB      # 64 MiB physical VMEM -> keep resident weight modest
    if "v6" in kind:
        return 24 * _MIB      # 128 MiB VMEM, DMA hides the S-fold MXU inflation
    if "v5" in kind:
        # v5e: block-diag does S x the useful MXU work; only allow it when cheap
        # (small expanded weight) or when streaming sub-32-bit inputs.
        return 16 * _MIB if compute_itemsize < 4 else 2 * _MIB
    return 8 * _MIB


def prepare_sequence_recovery_params(weight, bias, *, num_segments,
                                     compute_dtype=None) -> SeqRecParams:
    """Build (and cache outside the per-call path) the kernel-side weight/bias.

    weight: (W, H) PyTorch nn.Linear layout; bias: (W,).
    """
    W, H = weight.shape
    S = num_segments
    cdtype = jnp.dtype(compute_dtype) if compute_dtype is not None else jnp.dtype(weight.dtype)
    kind = _tpu_device_kind()

    n_valid = S * W
    n_pad = 128 * pl.cdiv(n_valid, 128)                    # keep stores lane-dense
    bias_f32 = bias.astype(jnp.float32)

    bd_bytes = (S * H) * n_pad * cdtype.itemsize
    if bd_bytes <= _block_diag_byte_cap(kind, cdtype.itemsize):
        wT = weight.T.astype(cdtype)                       # (H, W)
        eye = jnp.eye(S, dtype=cdtype)
        w_bd = (eye[:, None, :, None] * wT[None, :, None, :]).reshape(S * H, S * W)
        b_bd = jnp.tile(bias_f32, S).reshape(1, S * W)
        if n_pad != n_valid:
            w_bd = jnp.pad(w_bd, ((0, 0), (0, n_pad - n_valid)))
            b_bd = jnp.pad(b_bd, ((0, 0), (0, n_pad - n_valid)))
        return SeqRecParams("block_diag", w_bd, b_bd, n_valid, S, H, W)

    # Fallback: plain (H, W) weight, flat (B*S, H) rows.
    return SeqRecParams("flat", weight.T.astype(cdtype), bias_f32.reshape(1, W), W, S, H, W)


# ------------------------------------------------------------------- public forward
def sequence_recovery(x, weight=None, bias=None, *, num_segments, window_length,
                      params: Optional[SeqRecParams] = None, compute_dtype=None,
                      max_rows_per_block=None, use_pallas=True):
    """x: (B, S, H) -> (B, S*W), matching Linear(Dropout(x)).flatten(start_dim=-2)
    in eval mode. Dropout is eval-mode identity (see TODO at top of file)."""
    B, S, H = x.shape
    W = window_length
    assert S == num_segments

    if params is None:
        assert weight is not None and bias is not None
        params = prepare_sequence_recovery_params(
            weight, bias, num_segments=num_segments,
            compute_dtype=compute_dtype if compute_dtype is not None else x.dtype)
    assert params.hidden_dim == H and params.window_length == W

    out_dtype = x.dtype
    cdtype = params.w.dtype
    xin = x.astype(cdtype)

    if use_pallas is None:                                  # tiny problems -> fused XLA GEMM
        use_pallas = (B * S) >= 4096
    if not use_pallas:
        assert weight is not None and bias is not None
        y = jnp.einsum("bsh,wh->bsw", xin, weight.astype(cdtype),
                       preferred_element_type=jnp.float32) + bias.astype(jnp.float32)
        return y.reshape(B, S * W).astype(out_dtype)

    useful_flops = 2 * B * S * H * W

    if params.mode == "block_diag":
        xb = xin.reshape(B, S * H)                          # free, contiguous view
        out = _tiled_linear(xb, params.w, params.b, out_dtype=out_dtype,
                            useful_flops=useful_flops, max_rows=max_rows_per_block)
        if params.w.shape[1] != S * W:                      # strip lane padding
            out = out[:, : S * W]
        return out

    # Flat fallback: (B*S, H) rows against the plain (H, W) weight; reshape outside.
    x2d = xin.reshape(B * S, H)
    out2d = _tiled_linear(
        x2d, params.w, params.b, out_dtype=out_dtype, useful_flops=useful_flops,
        max_rows=(max_rows_per_block * S if max_rows_per_block is not None else None))
    return out2d.reshape(B, S * W)


# ----------------------------------------------------------------------- reference
def _reference(x, weight, bias):
    B, S, H = x.shape
    W = weight.shape[0]
    return (x @ weight.T + bias).reshape(B, S * W)


if __name__ == "__main__":
    num_segments = 8
    hidden_dim = 32
    window_length = 16

    key = jax.random.PRNGKey(0)
    kx, kw, kb, kx2 = jax.random.split(key, 4)

    bound = 1.0 / (hidden_dim ** 0.5)                       # nn.Linear-like deterministic init
    weight = jax.random.uniform(kw, (window_length, hidden_dim),
                                minval=-bound, maxval=bound, dtype=jnp.float32)
    bias = jax.random.uniform(kb, (window_length,),
                              minval=-bound, maxval=bound, dtype=jnp.float32)

    # Hoisted: build the block-diagonal kernel weight ONCE and reuse across calls.
    params = prepare_sequence_recovery_params(weight, bias, num_segments=num_segments,
                                              compute_dtype=jnp.float32)

    # Check 1: small batch, single-step grid (block = full row extent).
    batch = 2
    x = jax.random.normal(kx, (batch, num_segments, hidden_dim), dtype=jnp.float32)
    out = sequence_recovery(x, weight, bias, num_segments=num_segments,
                            window_length=window_length, params=params)
    out = jax.block_until_ready(out)
    ref = _reference(x, weight, bias)
    assert out.shape == (batch, num_segments * window_length)
    assert jnp.allclose(out, ref, atol=1e-5, rtol=1e-5)

    # Check 2: multi-step grid with a ragged last block (pipelining + masked boundary).
    batch2 = 20
    x2 = jax.random.normal(kx2, (batch2, num_segments, hidden_dim), dtype=jnp.float32)
    out2 = sequence_recovery(x2, weight, bias, num_segments=num_segments,
                             window_length=window_length, params=params,
                             max_rows_per_block=8)
    out2 = jax.block_until_ready(out2)
    ref2 = _reference(x2, weight, bias)
    assert out2.shape == (batch2, num_segments * window_length)
    assert jnp.allclose(out2, ref2, atol=1e-5, rtol=1e-5)

    print("KERNEL_OK")
</pallas_src>

<mosaic_0001>
module attributes {stable_mosaic.version = 11 : i64} {
  func.func @_linear_kernel(%arg0: i32, %arg1: memref<2x256xf32, #tpu.memory_space<vmem>>, %arg2: memref<256x128xf32, #tpu.memory_space<vmem>>, %arg3: memref<1x128xf32, #tpu.memory_space<vmem>>, %arg4: memref<2x128xf32, #tpu.memory_space<vmem>>) attributes {dimension_semantics = [#tpu.dimension_semantics<parallel>], iteration_bounds = array<i64: 1>, scalar_prefetch = 0 : i64, scratch_operands = 0 : i64, tpu.core_type = #tpu.core_type<tc>, window_params = [{transform_indices = @transform_0, window_bounds = array<i64: 2, 256>}, {pipeline_mode = #tpu.pipeline_mode<synchronous>, transform_indices = @transform_1, window_bounds = array<i64: 256, 128>}, {pipeline_mode = #tpu.pipeline_mode<synchronous>, transform_indices = @transform_2, window_bounds = array<i64: 1, 128>}, {transform_indices = @transform_3, window_bounds = array<i64: 2, 128>}]} {
    %c0 = arith.constant 0 : index
    %c0_0 = arith.constant 0 : index
    %0 = vector.load %arg1[%c0, %c0_0] : memref<2x256xf32, #tpu.memory_space<vmem>>, vector<2x256xf32>
    %c0_1 = arith.constant 0 : index
    %c0_2 = arith.constant 0 : index
    %1 = vector.load %arg2[%c0_1, %c0_2] : memref<256x128xf32, #tpu.memory_space<vmem>>, vector<256x128xf32>
    %cst = arith.constant dense<0.000000e+00> : vector<2x128xf32>
    %2 = tpu.matmul %0, %1, %cst {dimension_numbers = #tpu.dot_dimension_numbers<[1], [0], [0], [1], [0, 0, 1, 1], [], []>} : vector<2x256xf32>, vector<256x128xf32>, vector<2x128xf32> -> vector<2x128xf32>
    %c0_3 = arith.constant 0 : index
    %c0_4 = arith.constant 0 : index
    %3 = vector.load %arg3[%c0_3, %c0_4] : memref<1x128xf32, #tpu.memory_space<vmem>>, vector<1x128xf32>
    %4 = vector.broadcast %3 : vector<1x128xf32> to vector<2x128xf32>
    %5 = arith.addf %2, %4 : vector<2x128xf32>
    %c0_5 = arith.constant 0 : index
    %c0_6 = arith.constant 0 : index
    %6 = vector.load %arg4[%c0_5, %c0_6] : memref<2x128xf32, #tpu.memory_space<vmem>>, vector<2x128xf32>
    tpu.vector_store %arg4[%c0_5, %c0_6], %5 {strides = array<i32>} : memref<2x128xf32, #tpu.memory_space<vmem>>, vector<2x128xf32>,
    return
  }
  func.func @transform_0(%arg0: i32) -> (i32, i32) {
    %c0_i32 = arith.constant 0 : i32
    %c0_i32_0 = arith.constant 0 : i32
    return %arg0, %c0_i32 : i32, i32
  }
  func.func @transform_1(%arg0: i32) -> (i32, i32) {
    %c0_i32 = arith.constant 0 : i32
    %c0_i32_0 = arith.constant 0 : i32
    %c0_i32_1 = arith.constant 0 : i32
    return %c0_i32, %c0_i32_0 : i32, i32
  }
  func.func @transform_2(%arg0: i32) -> (i32, i32) {
    %c0_i32 = arith.constant 0 : i32
    %c0_i32_0 = arith.constant 0 : i32
    %c0_i32_1 = arith.constant 0 : i32
    return %c0_i32, %c0_i32_0 : i32, i32
  }
  func.func @transform_3(%arg0: i32) -> (i32, i32) {
    %c0_i32 = arith.constant 0 : i32
    %c0_i32_0 = arith.constant 0 : i32
    return %arg0, %c0_i32 : i32, i32
  }
}

module attributes {stable_mosaic.version = 11 : i64} {
  func.func @_linear_kernel(%arg0: i32, %arg1: memref<2x256xf32, #tpu.memory_space<vmem>>, %arg2: memref<256x128xf32, #tpu.memory_space<vmem>>, %arg3: memref<1x128xf32, #tpu.memory_space<vmem>>, %arg4: memref<2x128xf32, #tpu.memory_space<vmem>>) attributes {dimension_semantics = [#tpu.dimension_semantics<parallel>], iteration_bounds = array<i64: 1>, scalar_prefetch = 0 : i64, scratch_operands = 0 : i64, tpu.core_type = #tpu.core_type<tc>, window_params = [{transform_indices = @transform_0, window_bounds = array<i64: 2, 256>}, {pipeline_mode = #tpu.pipeline_mode<synchronous>, transform_indices = @transform_1, window_bounds = array<i64: 256, 128>}, {pipeline_mode = #tpu.pipeline_mode<synchronous>, transform_indices = @transform_2, window_bounds = array<i64: 1, 128>}, {transform_indices = @transform_3, window_bounds = array<i64: 2, 128>}]} {
    %c0 = arith.constant 0 : index
    %c0_0 = arith.constant 0 : index
    %0 = vector.load %arg1[%c0, %c0_0] : memref<2x256xf32, #tpu.memory_space<vmem>>, vector<2x256xf32>
    %c0_1 = arith.constant 0 : index
    %c0_2 = arith.constant 0 : index
    %1 = vector.load %arg2[%c0_1, %c0_2] : memref<256x128xf32, #tpu.memory_space<vmem>>, vector<256x128xf32>
    %cst = arith.constant dense<0.000000e+00> : vector<2x128xf32>
    %2 = tpu.matmul %0, %1, %cst {dimension_numbers = #tpu.dot_dimension_numbers<[1], [0], [0], [1], [0, 0, 1, 1], [], []>} : vector<2x256xf32>, vector<256x128xf32>, vector<2x128xf32> -> vector<2x128xf32>
    %c0_3 = arith.constant 0 : index
    %c0_4 = arith.constant 0 : index
    %3 = vector.load %arg3[%c0_3, %c0_4] : memref<1x128xf32, #tpu.memory_space<vmem>>, vector<1x128xf32>
    %4 = vector.broadcast %3 : vector<1x128xf32> to vector<2x128xf32>
    %5 = arith.addf %2, %4 : vector<2x128xf32>
    %c0_5 = arith.constant 0 : index
    %c0_6 = arith.constant 0 : index
    %6 = vector.load %arg4[%c0_5, %c0_6] : memref<2x128xf32, #tpu.memory_space<vmem>>, vector<2x128xf32>
    tpu.vector_store %arg4[%c0_5, %c0_6], %5 {strides = array<i32>} : memref<2x128xf32, #tpu.memory_space<vmem>>, vector<2x128xf32>,
    return
  }
  func.func @transform_0(%arg0: i32) -> (i32, i32) {
    %c0_i32 = arith.constant 0 : i32
    %c0_i32_0 = arith.constant 0 : i32
    return %arg0, %c0_i32 : i32, i32
  }
  func.func @transform_1(%arg0: i32) -> (i32, i32) {
    %c0_i32 = arith.constant 0 : i32
    %c0_i32_0 = arith.constant 0 : i32
    %c0_i32_1 = arith.constant 0 : i32
    return %c0_i32, %c0_i32_0 : i32, i32
  }
  func.func @transform_2(%arg0: i32) -> (i32, i32) {
    %c0_i32 = arith.constant 0 : i32
    %c0_i32_0 = arith.constant 0 : i32
    %c0_i32_1 = arith.constant 0 : i32
    return %c0_i32, %c0_i32_0 : i32, i32
  }
  func.func @transform_3(%arg0: i32) -> (i32, i32) {
    %c0_i32 = arith.constant 0 : i32
    %c0_i32_0 = arith.constant 0 : i32
    return %arg0, %c0_i32 : i32, i32
  }
}

</mosaic_0001>

<bundles_post_ra>
// kernel: tpu_custom_call.1
= control target key start
LH: loop header
LB: loop body
LE: loop exit
PB: predicated region body
PF: predicated region fallthrough
CT: control target
= control target key end

     0   :  { %8 = vsyncpa [#allocation3], 0  ;;  %s324_s0 = inlined_call_operand.hbm [shape: f32[2,256], index: 0, kind: input, shape index: {}]   ;;  %s325_s1 = inlined_call_operand.hbm [shape: f32[256,128], index: 1, kind: input, shape index: {}]   ;;  %s326_s2 = inlined_call_operand.vmem [shape: f32[1,128], index: 2, kind: input, shape index: {}]   ;;  %s327_s3 = inlined_call_operand.hbm [shape: f32[2,128], index: 3, kind: output, shape index: {}]  }
   0x1   :  { %9 = vsyncpa [#allocation6], 0 }
   0x2   :  { %10 = vsyncpa [#allocation4], 0  ;;  %s287_s12 = smov [#allocation2]   ;;  %s288_s14 = smov [#allocation5]  }
   0x3   :  { %s17_s13 = sshll.u32 %s287_s12, 4  ;;  %s26_s15 = sshll.u32 %s288_s14, 4  ;;  %s18_s13 = int_to_ptr.vmem [resolvable:$true] %s17_s13  ;;  %s27_s15 = int_to_ptr.vmem [resolvable:$true] %s26_s15 }
   0x4   :  { %s229_s16 = scalar_lea.vmem %s18_s13, 64  ;;  %p234_p1 = scmp.lt.s32.totalorder %s18_s13, %s18_s13 }
   0x5   :  { %p230_p0 = scmp.ne.s32.totalorder %s18_s13, %s229_s16  ;;  %p235_p2 = scmp.lt.s32.totalorder %s229_s16, %s229_s16 }
   0x7   :  { %p236_p3 = por %p235_p2, %p234_p1 }
   0x9   :  { %p237_p4 = pnand %p236_p3, %p230_p0 }
   0xb   :  { %240 = shalt.err (!%p237_p4)
}
   0xc   :  { %20 = dma.hbm_to_vmem [thread:$0]  %s324_s0, 64, %s18_s13, [#allocation3]  }
   0xd   :  { %s249_s19 = scalar_lea.vmem %s27_s15, 4096  ;;  %p254_p6 = scmp.lt.s32.totalorder %s27_s15, %s27_s15 }
   0xe   :  { %p250_p5 = scmp.ne.s32.totalorder %s27_s15, %s249_s19  ;;  %p255_p7 = scmp.lt.s32.totalorder %s249_s19, %s249_s19 }
  0x10   :  { %p256_p8 = por %p255_p7, %p254_p6 }
  0x12   :  { %p257_p9 = pnand %p256_p8, %p250_p5 }
  0x14   :  { %260 = shalt.err (!%p257_p9)
}
  0x15   :  { %s289_s20 = smov 128   ;;  %s290_s21 = smov 8  }
  0x16   :  { %32 = dma.hbm_to_vmem [thread:$0]  %s325_s1, 4096, %s27_s15, [#allocation6], %s289_s20, %s289_s20, %s290_s21  }
  0x17   :  { %281 = dma.done.wait [#allocation3], 64  }
  0x18   :  { %282 = vsyncadd [#allocation3], 4294967232 }
  0x19   :  { %283 = dma.done.wait [#allocation6], 4096  }
  0x1a   :  { %284 = vsyncadd [#allocation6], 4294963200  ;;  %v73_v0 = vld [vmem:[#allocation5 + $0xf8] sm:$0xff]  ;;  %v72_v2 = vld [vmem:[#allocation5 + $0xf0] sm:$0xff]  ;;  %s291_s24 = smov [#allocation7]  }
  0x1b   :  { %v57_v1 = vld [vmem:[#allocation5 + $0x78] sm:$0xff]  ;;  %181 = vmatprep.subr.mxu0 %v73_v0  ;;  %v56_v3 = vld [vmem:[#allocation5 + $0x70] sm:$0xff]  ;;  %v71_v4 = vld [vmem:[#allocation5 + $0xe8] sm:$0xff]  ;;  %s169_s25 = sshll.u32 %s291_s24, 4  ;;  %s170_s25 = int_to_ptr.vmem [resolvable:$true] %s169_s25 }
  0x1c   :  { %182 = vmatpush3.msra.mxu0 %v57_v1  ;;  %v55_v5 = vld [vmem:[#allocation5 + $0x68] sm:$0xff]  ;;  %v70_v6 = vld [vmem:[#allocation5 + $0xe0] sm:$0xff]  ;;  %v69_v8 = vld [vmem:[#allocation5 + $0xd8] sm:$0xff]  ;;  %s261_s26 = scalar_lea.vmem %s170_s25, 32  ;;  %p266_p11 = scmp.lt.s32.totalorder %s170_s25, %s170_s25 }
  0x1d   :  { %183 = vmatprep.subr.mxu0 %v72_v2  ;;  %v54_v7 = vld [vmem:[#allocation5 + $0x60] sm:$0xff]  ;;  %v53_v9 = vld [vmem:[#allocation5 + $0x58] sm:$0xff]  ;;  %v68_v10 = vld [vmem:[#allocation5 + $0xd0] sm:$0xff]  ;;  %p262_p10 = scmp.ne.s32.totalorder %s170_s25, %s261_s26  ;;  %p267_p12 = scmp.lt.s32.totalorder %s261_s26, %s261_s26 }
  0x1e   :  { %184 = vmatpush3.msra.mxu0 %v56_v3  ;;  %v52_v11 = vld [vmem:[#allocation5 + $0x50] sm:$0xff]  ;;  %v67_v12 = vld [vmem:[#allocation5 + $0xc8] sm:$0xff]  ;;  %v180_v13 = vld.sshfl [vmem:[#allocation2] sm:$0x33 pattern:$0x76325410] }
  0x1f   :  { %185 = vmatprep.subr.mxu0 %v71_v4  ;;  %v51_v14 = vld [vmem:[#allocation5 + $0x48] sm:$0xff]  ;;  %v89_v15 = vcombine.high %v180_v13, %v180_v13  ;;  %v66_v16 = vld [vmem:[#allocation5 + $0xc0] sm:$0xff]  ;;  %v65_v18 = vld [vmem:[#allocation5 + $0xb8] sm:$0xff]  ;;  %p268_p13 = por %p267_p12, %p266_p11 }
  0x20   :  { %186 = vmatpush3.msra.mxu0 %v55_v5  ;;  %v50_v17 = vld [vmem:[#allocation5 + $0x40] sm:$0xff]  ;;  %v49_v19 = vld [vmem:[#allocation5 + $0x38] sm:$0xff]  ;;  %v64_v20 = vld [vmem:[#allocation5 + $0xb0] sm:$0xff] }
  0x21   :  { %187 = vmatprep.subr.mxu0 %v70_v6  ;;  %156 = vmatprep.mubr.f32.mxu0 %v89_v15  ;;  %v48_v21 = vld [vmem:[#allocation5 + $0x30] sm:$0xff]  ;;  %v63_v22 = vld [vmem:[#allocation5 + $0xa8] sm:$0xff]  ;;  %v62_v24 = vld [vmem:[#allocation5 + $0xa0] sm:$0xff]  ;;  %p269_p0 = pnand %p268_p13, %p262_p10 }
  0x22   :  { %188 = vmatpush3.msra.mxu0 %v54_v7  ;;  %v47_v23 = vld [vmem:[#allocation5 + $0x28] sm:$0xff]  ;;  %v46_v25 = vld [vmem:[#allocation5 + $0x20] sm:$0xff]  ;;  %v61_v26 = vld [vmem:[#allocation5 + $0x98] sm:$0xff] }
  0x23   :  { %189 = vmatprep.subr.mxu0 %v69_v8  ;;  %v45_v27 = vld [vmem:[#allocation5 + $0x18] sm:$0xff]  ;;  %v60_v28 = vld [vmem:[#allocation5 + $0x90] sm:$0xff]  ;;  %v59_v30 = vld [vmem:[#allocation5 + $0x88] sm:$0xff] }
  0x24   :  { %190 = vmatpush3.msra.mxu0 %v53_v9  ;;  %v44_v29 = vld [vmem:[#allocation5 + $0x10] sm:$0xff]  ;;  %v43_v31 = vld [vmem:[#allocation5 + $0x8] sm:$0xff]  ;;  %v58_v32 = vld [vmem:[#allocation5 + $0x80] sm:$0xff] }
  0x25   :  { %191 = vmatprep.subr.mxu0 %v68_v10  ;;  %v42_v33 = vld [vmem:[#allocation5] sm:$0xff]  ;;  %v179_v35 = vld [vmem:[%s326_s2] ss:$0 sm:$0xff] }
  0x26   :  { %192 = vmatpush3.msra.mxu0 %v52_v11 }
  0x27   :  { %193 = vmatprep.subr.mxu0 %v67_v12 }
  0x28   :  { %194 = vmatpush3.msra.mxu0 %v51_v14 }
  0x29   :  { %195 = vmatprep.subr.mxu0 %v66_v16 }
  0x2a   :  { %196 = vmatpush3.msra.mxu0 %v50_v17 }
  0x2b   :  { %197 = vmatprep.subr.mxu0 %v65_v18 }
  0x2c   :  { %198 = vmatpush3.msra.mxu0 %v49_v19 }
  0x2d   :  { %199 = vmatprep.subr.mxu0 %v64_v20 }
  0x2e   :  { %200 = vmatpush3.msra.mxu0 %v48_v21 }
  0x2f   :  { %201 = vmatprep.subr.mxu0 %v63_v22 }
  0x30   :  { %202 = vmatpush3.msra.mxu0 %v47_v23 }
  0x31   :  { %203 = vmatprep.subr.mxu0 %v62_v24 }
  0x32   :  { %204 = vmatpush3.msra.mxu0 %v46_v25 }
  0x33   :  { %205 = vmatprep.subr.mxu0 %v61_v26 }
  0x34   :  { %206 = vmatpush3.msra.mxu0 %v45_v27 }
  0x35   :  { %207 = vmatprep.subr.mxu0 %v60_v28 }
  0x36   :  { %208 = vmatpush3.msra.mxu0 %v44_v29 }
  0x37   :  { %209 = vmatprep.subr.mxu0 %v59_v30 }
  0x38   :  { %210 = vmatpush3.msra.mxu0 %v43_v31 }
  0x39   :  { %211 = vmatprep.subr.mxu0 %v58_v32 }
  0x3a   :  { %212 = vmatpush3.msra.mxu0 %v42_v33 }
  0x3b   :  { %157 = vmatmul.mubr.f32.vlgmr.msra.gmra.mxu0 %v180_v13 }
  0xfb   :  { %v213_v34 = vpop.f32.mrf.mxu0 }
  0xfd   :  { %v214_v36 = vpop.f32.mrf.mxu0 }
  0xfe   :  { %v215_v37 = vadd.f32 %v214_v36, %v213_v34 }
 0x100   :  { %v159_v38 = vadd.f32 %v215_v37, %v179_v35 }
 0x102   :  { %162 = vst [vmem:[#allocation7] sm:$0x3] %v159_v38 }
 0x103   :  { %272 = shalt.err (!%p269_p0)
}
 0x104   :  { %172 = dma.vmem_to_hbm [thread:$0]  %s170_s25, 32, %s327_s3, [#allocation4]  }
 0x105   :  { %285 = dma.done.wait [#allocation4], 32  }
 0x106   :  { %286 = vsyncadd [#allocation4], 4294967264 }
 0x107   :  { %176 = vsyncpa [#allocation3], 1 }
 0x108   :  { %177 = vsyncpa [#allocation6], 1 }
 0x109   :  { %178 = vsyncpa [#allocation4], 1 }

// kernel: tpu_custom_call.1
= control target key start
LH: loop header
LB: loop body
LE: loop exit
PB: predicated region body
PF: predicated region fallthrough
CT: control target
= control target key end

     0   :  { %8 = vsyncpa [#allocation3], 0  ;;  %s324_s0 = inlined_call_operand.hbm [shape: f32[2,256], index: 0, kind: input, shape index: {}]   ;;  %s325_s1 = inlined_call_operand.hbm [shape: f32[256,128], index: 1, kind: input, shape index: {}]   ;;  %s326_s2 = inlined_call_operand.vmem [shape: f32[1,128], index: 2, kind: input, shape index: {}]   ;;  %s327_s3 = inlined_call_operand.hbm [shape: f32[2,128], index: 3, kind: output, shape index: {}]  }
   0x1   :  { %9 = vsyncpa [#allocation6], 0 }
   0x2   :  { %10 = vsyncpa [#allocation4], 0  ;;  %s287_s12 = smov [#allocation2]   ;;  %s288_s14 = smov [#allocation5]  }
   0x3   :  { %s17_s13 = sshll.u32 %s287_s12, 4  ;;  %s26_s15 = sshll.u32 %s288_s14, 4  ;;  %s18_s13 = int_to_ptr.vmem [resolvable:$true] %s17_s13  ;;  %s27_s15 = int_to_ptr.vmem [resolvable:$true] %s26_s15 }
   0x4   :  { %s229_s16 = scalar_lea.vmem %s18_s13, 64  ;;  %p234_p1 = scmp.lt.s32.totalorder %s18_s13, %s18_s13 }
   0x5   :  { %p230_p0 = scmp.ne.s32.totalorder %s18_s13, %s229_s16  ;;  %p235_p2 = scmp.lt.s32.totalorder %s229_s16, %s229_s16 }
   0x7   :  { %p236_p3 = por %p235_p2, %p234_p1 }
   0x9   :  { %p237_p4 = pnand %p236_p3, %p230_p0 }
   0xb   :  { %240 = shalt.err (!%p237_p4)
}
   0xc   :  { %20 = dma.hbm_to_vmem [thread:$0]  %s324_s0, 64, %s18_s13, [#allocation3]  }
   0xd   :  { %s249_s19 = scalar_lea.vmem %s27_s15, 4096  ;;  %p254_p6 = scmp.lt.s32.totalorder %s27_s15, %s27_s15 }
   0xe   :  { %p250_p5 = scmp.ne.s32.totalorder %s27_s15, %s249_s19  ;;  %p255_p7 = scmp.lt.s32.totalorder %s249_s19, %s249_s19 }
  0x10   :  { %p256_p8 = por %p255_p7, %p254_p6 }
  0x12   :  { %p257_p9 = pnand %p256_p8, %p250_p5 }
  0x14   :  { %260 = shalt.err (!%p257_p9)
}
  0x15   :  { %s289_s20 = smov 128   ;;  %s290_s21 = smov 8  }
  0x16   :  { %32 = dma.hbm_to_vmem [thread:$0]  %s325_s1, 4096, %s27_s15, [#allocation6], %s289_s20, %s289_s20, %s290_s21  }
  0x17   :  { %281 = dma.done.wait [#allocation3], 64  }
  0x18   :  { %282 = vsyncadd [#allocation3], 4294967232 }
  0x19   :  { %283 = dma.done.wait [#allocation6], 4096  }
  0x1a   :  { %284 = vsyncadd [#allocation6], 4294963200  ;;  %v73_v0 = vld [vmem:[#allocation5 + $0xf8] sm:$0xff]  ;;  %v72_v2 = vld [vmem:[#allocation5 + $0xf0] sm:$0xff]  ;;  %s291_s24 = smov [#allocation7]  }
  0x1b   :  { %v57_v1 = vld [vmem:[#allocation5 + $0x78] sm:$0xff]  ;;  %181 = vmatprep.subr.mxu0 %v73_v0  ;;  %v56_v3 = vld [vmem:[#allocation5 + $0x70] sm:$0xff]  ;;  %v71_v4 = vld [vmem:[#allocation5 + $0xe8] sm:$0xff]  ;;  %s169_s25 = sshll.u32 %s291_s24, 4  ;;  %s170_s25 = int_to_ptr.vmem [resolvable:$true] %s169_s25 }
  0x1c   :  { %182 = vmatpush3.msra.mxu0 %v57_v1  ;;  %v55_v5 = vld [vmem:[#allocation5 + $0x68] sm:$0xff]  ;;  %v70_v6 = vld [vmem:[#allocation5 + $0xe0] sm:$0xff]  ;;  %v69_v8 = vld [vmem:[#allocation5 + $0xd8] sm:$0xff]  ;;  %s261_s26 = scalar_lea.vmem %s170_s25, 32  ;;  %p266_p11 = scmp.lt.s32.totalorder %s170_s25, %s170_s25 }
  0x1d   :  { %183 = vmatprep.subr.mxu0 %v72_v2  ;;  %v54_v7 = vld [vmem:[#allocation5 + $0x60] sm:$0xff]  ;;  %v53_v9 = vld [vmem:[#allocation5 + $0x58] sm:$0xff]  ;;  %v68_v10 = vld [vmem:[#allocation5 + $0xd0] sm:$0xff]  ;;  %p262_p10 = scmp.ne.s32.totalorder %s170_s25, %s261_s26  ;;  %p267_p12 = scmp.lt.s32.totalorder %s261_s26, %s261_s26 }
  0x1e   :  { %184 = vmatpush3.msra.mxu0 %v56_v3  ;;  %v52_v11 = vld [vmem:[#allocation5 + $0x50] sm:$0xff]  ;;  %v67_v12 = vld [vmem:[#allocation5 + $0xc8] sm:$0xff]  ;;  %v180_v13 = vld.sshfl [vmem:[#allocation2] sm:$0x33 pattern:$0x76325410] }
  0x1f   :  { %185 = vmatprep.subr.mxu0 %v71_v4  ;;  %v51_v14 = vld [vmem:[#allocation5 + $0x48] sm:$0xff]  ;;  %v89_v15 = vcombine.high %v180_v13, %v180_v13  ;;  %v66_v16 = vld [vmem:[#allocation5 + $0xc0] sm:$0xff]  ;;  %v65_v18 = vld [vmem:[#allocation5 + $0xb8] sm:$0xff]  ;;  %p268_p13 = por %p267_p12, %p266_p11 }
  0x20   :  { %186 = vmatpush3.msra.mxu0 %v55_v5  ;;  %v50_v17 = vld [vmem:[#allocation5 + $0x40] sm:$0xff]  ;;  %v49_v19 = vld [vmem:[#allocation5 + $0x38] sm:$0xff]  ;;  %v64_v20 = vld [vmem:[#allocation5 + $0xb0] sm:$0xff] }
  0x21   :  { %187 = vmatprep.subr.mxu0 %v70_v6  ;;  %156 = vmatprep.mubr.f32.mxu0 %v89_v15  ;;  %v48_v21 = vld [vmem:[#allocation5 + $0x30] sm:$0xff]  ;;  %v63_v22 = vld [vmem:[#allocation5 + $0xa8] sm:$0xff]  ;;  %v62_v24 = vld [vmem:[#allocation5 + $0xa0] sm:$0xff]  ;;  %p269_p0 = pnand %p268_p13, %p262_p10 }
  0x22   :  { %188 = vmatpush3.msra.mxu0 %v54_v7  ;;  %v47_v23 = vld [vmem:[#allocation5 + $0x28] sm:$0xff]  ;;  %v46_v25 = vld [vmem:[#allocation5 + $0x20] sm:$0xff]  ;;  %v61_v26 = vld [vmem:[#allocation5 + $0x98] sm:$0xff] }
  0x23   :  { %189 = vmatprep.subr.mxu0 %v69_v8  ;;  %v45_v27 = vld [vmem:[#allocation5 + $0x18] sm:$0xff]  ;;  %v60_v28 = vld [vmem:[#allocation5 + $0x90] sm:$0xff]  ;;  %v59_v30 = vld [vmem:[#allocation5 + $0x88] sm:$0xff] }
  0x24   :  { %190 = vmatpush3.msra.mxu0 %v53_v9  ;;  %v44_v29 = vld [vmem:[#allocation5 + $0x10] sm:$0xff]  ;;  %v43_v31 = vld [vmem:[#allocation5 + $0x8] sm:$0xff]  ;;  %v58_v32 = vld [vmem:[#allocation5 + $0x80] sm:$0xff] }
  0x25   :  { %191 = vmatprep.subr.mxu0 %v68_v10  ;;  %v42_v33 = vld [vmem:[#allocation5] sm:$0xff]  ;;  %v179_v35 = vld [vmem:[%s326_s2] ss:$0 sm:$0xff] }
  0x26   :  { %192 = vmatpush3.msra.mxu0 %v52_v11 }
  0x27   :  { %193 = vmatprep.subr.mxu0 %v67_v12 }
  0x28   :  { %194 = vmatpush3.msra.mxu0 %v51_v14 }
  0x29   :  { %195 = vmatprep.subr.mxu0 %v66_v16 }
  0x2a   :  { %196 = vmatpush3.msra.mxu0 %v50_v17 }
  0x2b   :  { %197 = vmatprep.subr.mxu0 %v65_v18 }
  0x2c   :  { %198 = vmatpush3.msra.mxu0 %v49_v19 }
  0x2d   :  { %199 = vmatprep.subr.mxu0 %v64_v20 }
  0x2e   :  { %200 = vmatpush3.msra.mxu0 %v48_v21 }
  0x2f   :  { %201 = vmatprep.subr.mxu0 %v63_v22 }
  0x30   :  { %202 = vmatpush3.msra.mxu0 %v47_v23 }
  0x31   :  { %203 = vmatprep.subr.mxu0 %v62_v24 }
  0x32   :  { %204 = vmatpush3.msra.mxu0 %v46_v25 }
  0x33   :  { %205 = vmatprep.subr.mxu0 %v61_v26 }
  0x34   :  { %206 = vmatpush3.msra.mxu0 %v45_v27 }
  0x35   :  { %207 = vmatprep.subr.mxu0 %v60_v28 }
  0x36   :  { %208 = vmatpush3.msra.mxu0 %v44_v29 }
  0x37   :  { %209 = vmatprep.subr.mxu0 %v59_v30 }
  0x38   :  { %210 = vmatpush3.msra.mxu0 %v43_v31 }
  0x39   :  { %211 = vmatprep.subr.mxu0 %v58_v32 }
  0x3a   :  { %212 = vmatpush3.msra.mxu0 %v42_v33 }
  0x3b   :  { %157 = vmatmul.mubr.f32.vlgmr.msra.gmra.mxu0 %v180_v13 }
  0xfb   :  { %v213_v34 = vpop.f32.mrf.mxu0 }
  0xfd   :  { %v214_v36 = vpop.f32.mrf.mxu0 }
  0xfe   :  { %v215_v37 = vadd.f32 %v214_v36, %v213_v34 }
 0x100   :  { %v159_v38 = vadd.f32 %v215_v37, %v179_v35 }
 0x102   :  { %162 = vst [vmem:[#allocation7] sm:$0x3] %v159_v38 }
 0x103   :  { %272 = shalt.err (!%p269_p0)
}
 0x104   :  { %172 = dma.vmem_to_hbm [thread:$0]  %s170_s25, 32, %s327_s3, [#allocation4]  }
 0x105   :  { %285 = dma.done.wait [#allocation4], 32  }
 0x106   :  { %286 = vsyncadd [#allocation4], 4294967264 }
 0x107   :  { %176 = vsyncpa [#allocation3], 1 }
 0x108   :  { %177 = vsyncpa [#allocation6], 1 }
 0x109   :  { %178 = vsyncpa [#allocation4], 1 }

</bundles_post_ra>
